<compile_context>
chip_gen: v7x
topology: tpu7x:2x2x1
jax: 0.10.0
libtpu: 0.0.40
codegen_flags: <defaults>
</compile_context>

<pallas_src>
import math

import jax
import jax.numpy as jnp
from jax.experimental import pallas as pl
from jax.experimental.pallas import tpu as pltpu

_EPS = 1e-12           # torch.nn.functional.normalize default eps
_LANES = 128
_SUBLANES = 8
_BLOCK_BYTES = 2 * 1024 * 1024   # ~2 MiB/block -> 8 MiB pipelined (in+out, x2 buffers)


def _l2_normalize_mid_kernel(x_ref, o_ref):
    # x_ref / o_ref: (bp, C, t) VMEM tiles; normalize along axis=1 (the C axis).
    x = x_ref[...].astype(jnp.float32)
    sumsq = jnp.sum(x * x, axis=1, keepdims=True)            # (bp, 1, t) sublane reduce
    inv = 1.0 / jnp.maximum(jnp.sqrt(sumsq), _EPS)           # one exact divide / lane col
    o_ref[...] = (x * inv).astype(o_ref.dtype)


def _l2_normalize_last_kernel(x_ref, o_ref):
    # x_ref / o_ref: (bp, C) VMEM tiles; normalize along the last (lane) axis.
    x = x_ref[...].astype(jnp.float32)
    sumsq = jnp.sum(x * x, axis=-1, keepdims=True)           # (bp, 1) lane reduce (XLU)
    inv = 1.0 / jnp.maximum(jnp.sqrt(sumsq), _EPS)
    o_ref[...] = (x * inv).astype(o_ref.dtype)


def _compiler_params(block_bytes, n_grid_axes):
    # in + out, double-buffered, plus a little headroom.
    vmem_needed = 4 * block_bytes + (1 << 20)
    return pltpu.CompilerParams(
        dimension_semantics=("parallel",) * n_grid_axes,
        vmem_limit_bytes=vmem_needed if vmem_needed > (12 << 20) else None,
    )


def l2_normalize(x: jax.Array, dim: int = 1) -> jax.Array:
    """L2-normalize `x` along `dim` (p=2, eps=1e-12), matching F.normalize."""
    orig_shape = x.shape
    dim = dim % x.ndim
    pre = math.prod(orig_shape[:dim]) if dim > 0 else 1
    c = orig_shape[dim]
    post = math.prod(orig_shape[dim + 1:]) if dim + 1 < x.ndim else 1

    itemsize = jnp.dtype(x.dtype).itemsize
    n_elem = pre * c * post
    cost = pl.CostEstimate(
        flops=3 * n_elem,
        transcendentals=pre * post,
        bytes_accessed=2 * n_elem * itemsize,
    )

    if post == 1:
        # Reduction axis is the (flattened) last axis: put C on the lane axis.
        x2 = x.reshape(pre, c)
        row_bytes = max(itemsize * c, 1)
        budget_bp = max(_SUBLANES, (_BLOCK_BYTES // row_bytes) // _SUBLANES * _SUBLANES)
        bp = pre if pre <= budget_bp else budget_bp      # full dim, or multiple of 8
        block_bytes = itemsize * bp * c
        out = pl.pallas_call(
            _l2_normalize_last_kernel,
            out_shape=jax.ShapeDtypeStruct((pre, c), x.dtype),
            grid_spec=pl.GridSpec(
                grid=(pl.cdiv(pre, bp),),
                in_specs=[pl.BlockSpec((bp, c), lambda i: (i, 0))],
                out_specs=pl.BlockSpec((bp, c), lambda i: (i, 0)),
            ),
            compiler_params=_compiler_params(block_bytes, 1),
            cost_estimate=cost,
        )(x2)
        return out.reshape(orig_shape)

    # General case: reduce along the middle axis of (pre, C, post).
    # Contiguous row-major reshape — layout-preserving, no extra HBM pass.
    x3 = x.reshape(pre, c, post)

    bytes_per_lane_col = max(itemsize * c, 1)
    if post >= _LANES:
        max_lanes = max(
            _LANES,
            (_BLOCK_BYTES // bytes_per_lane_col) // _LANES * _LANES,
        )
        # Multiple of 128 lanes; ragged last tile handled by the cdiv grid.
        t = min((post // _LANES) * _LANES, max_lanes)
    else:
        # post < 128: only now fall back to the full (small) dim.
        t = post
    # TODO(synk): for C so large that itemsize*C*t alone exceeds the per-generation
    # VMEM budget, split C across an extra "arbitrary" grid axis with an accumulator
    # (two-pass sum+normalize) instead of one monolithic block.
    slab_bytes = max(itemsize * c * t, 1)
    bp = max(1, min(pre, _BLOCK_BYTES // slab_bytes))    # grow along `pre` to ~2 MiB
    block_bytes = itemsize * bp * c * t

    out = pl.pallas_call(
        _l2_normalize_mid_kernel,
        out_shape=jax.ShapeDtypeStruct((pre, c, post), x.dtype),
        grid_spec=pl.GridSpec(
            grid=(pl.cdiv(pre, bp), pl.cdiv(post, t)),
            in_specs=[pl.BlockSpec((bp, c, t), lambda i, j: (i, 0, j))],
            out_specs=pl.BlockSpec((bp, c, t), lambda i, j: (i, 0, j)),
        ),
        compiler_params=_compiler_params(block_bytes, 2),
        cost_estimate=cost,
    )(x3)
    return out.reshape(orig_shape)


class Normalize:
    """JAX/Pallas port of the PyTorch Normalize module (F.normalize, p=2)."""

    def __init__(self, dim=1):
        self.dim = dim

    def __call__(self, x):
        return l2_normalize(x, dim=self.dim)


def _ref_normalize(x, dim):
    norm = jnp.sqrt(jnp.sum(x.astype(jnp.float32) ** 2, axis=dim, keepdims=True))
    return (x / jnp.maximum(norm, _EPS)).astype(x.dtype)


if __name__ == "__main__":
    key = jax.random.PRNGKey(0)

    # Case 1: NCHW, normalize over channels (default dim=1).
    x = jax.random.normal(key, (2, 4, 16, 16), dtype=jnp.float32)
    y = jax.block_until_ready(Normalize(dim=1)(x))
    ref = _ref_normalize(x, 1)
    assert y.shape == x.shape and y.dtype == x.dtype
    assert jnp.allclose(y, ref, atol=1e-6, rtol=1e-6)

    # Case 2: last-axis normalization (exercises the lane-reduce path).
    k2 = jax.random.split(key, 2)[1]
    x2 = jax.random.normal(k2, (8, 32), dtype=jnp.float32)
    y2 = jax.block_until_ready(Normalize(dim=-1)(x2))
    ref2 = _ref_normalize(x2, -1)
    assert y2.shape == x2.shape and y2.dtype == x2.dtype
    assert jnp.allclose(y2, ref2, atol=1e-6, rtol=1e-6)

    print("KERNEL_OK")
</pallas_src>

<mosaic_0001>
module attributes {stable_mosaic.version = 11 : i64} {
  func.func @_l2_normalize_mid_kernel(%arg0: i32, %arg1: i32, %arg2: memref<2x4x256xf32, #tpu.memory_space<vmem>>, %arg3: memref<2x4x256xf32, #tpu.memory_space<vmem>>) attributes {dimension_semantics = [#tpu.dimension_semantics<parallel>, #tpu.dimension_semantics<parallel>], iteration_bounds = array<i64: 1, 1>, scalar_prefetch = 0 : i64, scratch_operands = 0 : i64, tpu.core_type = #tpu.core_type<tc>, window_params = [{transform_indices = @transform_0, window_bounds = array<i64: 2, 4, 256>}, {transform_indices = @transform_1, window_bounds = array<i64: 2, 4, 256>}]} {
    %c0 = arith.constant 0 : index
    %c0_0 = arith.constant 0 : index
    %c0_1 = arith.constant 0 : index
    %0 = vector.load %arg2[%c0, %c0_0, %c0_1] : memref<2x4x256xf32, #tpu.memory_space<vmem>>, vector<2x4x256xf32>
    %1 = arith.mulf %0, %0 : vector<2x4x256xf32>
    %cst = arith.constant dense<0.000000e+00> : vector<2x256xf32>
    %2 = vector.multi_reduction <add>, %1, %cst [1] : vector<2x4x256xf32> to vector<2x256xf32>
    %3 = vector.shape_cast %2 : vector<2x256xf32> to vector<2x1x256xf32>
    %4 = math.sqrt %3 : vector<2x1x256xf32>
    %cst_2 = arith.constant 9.99999996E-13 : f32
    %5 = vector.broadcast %cst_2 : f32 to vector<2x1x256xf32>
    %6 = arith.maximumf %4, %5 : vector<2x1x256xf32>
    %cst_3 = arith.constant 1.000000e+00 : f32
    %7 = vector.broadcast %cst_3 : f32 to vector<2x1x256xf32>
    %8 = arith.divf %7, %6 : vector<2x1x256xf32>
    %9 = vector.broadcast %8 : vector<2x1x256xf32> to vector<2x4x256xf32>
    %10 = arith.mulf %0, %9 : vector<2x4x256xf32>
    %c0_4 = arith.constant 0 : index
    %c0_5 = arith.constant 0 : index
    %c0_6 = arith.constant 0 : index
    %11 = vector.load %arg3[%c0_4, %c0_5, %c0_6] : memref<2x4x256xf32, #tpu.memory_space<vmem>>, vector<2x4x256xf32>
    tpu.vector_store %arg3[%c0_4, %c0_5, %c0_6], %10 {strides = array<i32>} : memref<2x4x256xf32, #tpu.memory_space<vmem>>, vector<2x4x256xf32>,
    return
  }
  func.func @transform_0(%arg0: i32, %arg1: i32) -> (i32, i32, i32) {
    %c0_i32 = arith.constant 0 : i32
    %c0_i32_0 = arith.constant 0 : i32
    return %arg0, %c0_i32, %arg1 : i32, i32, i32
  }
  func.func @transform_1(%arg0: i32, %arg1: i32) -> (i32, i32, i32) {
    %c0_i32 = arith.constant 0 : i32
    %c0_i32_0 = arith.constant 0 : i32
    return %arg0, %c0_i32, %arg1 : i32, i32, i32
  }
}

</mosaic_0001>

<bundles_post_ra>
// kernel: tpu_custom_call.1
= control target key start
LH: loop header
LB: loop body
LE: loop exit
PB: predicated region body
PF: predicated region fallthrough
CT: control target
= control target key end

     0   :  { %6 = vsyncpa [#allocation3], 0  ;;  %s256_s0 = inlined_call_operand.hbm [shape: f32[2,4,256], index: 0, kind: input, shape index: {}]   ;;  %s257_s1 = inlined_call_operand.hbm [shape: f32[2,4,256], index: 1, kind: output, shape index: {}]  }
   0x1   :  { %7 = vsyncpa [#allocation4], 0  ;;  %s199_s6 = smov [#allocation2]   ;;  %s151_s10 = scalar_lea.hbm %s256_s0, 256 }
   0x2   :  { %s13_s7 = sshll.u32 %s199_s6, 4  ;;  %p152_p0 = scmp.ne.s32.totalorder %s256_s0, %s151_s10  ;;  %s14_s7 = int_to_ptr.vmem [resolvable:$true] %s13_s7 }
   0x3   :  { %p155_p1 = scmp.lt.u32.totalorder %s151_s10, %s256_s0 }
   0x5   :  { %p157_p2 = pnand %p155_p1, %p152_p0 }
   0x7   :  { %160 = shalt.err (!%p157_p2)
}
   0x8   :  { %s161_s15 = scalar_lea.vmem %s14_s7, 256  ;;  %p166_p4 = scmp.lt.s32.totalorder %s14_s7, %s14_s7 }
   0x9   :  { %p162_p3 = scmp.ne.s32.totalorder %s14_s7, %s161_s15  ;;  %p167_p5 = scmp.lt.s32.totalorder %s161_s15, %s161_s15 }
   0xb   :  { %p168_p6 = por %p167_p5, %p166_p4 }
   0xd   :  { %p169_p7 = pnand %p168_p6, %p162_p3 }
   0xf   :  { %172 = shalt.err (!%p169_p7)
}
  0x10   :  { %s200_s16 = smov 128   ;;  %s201_s17 = smov 8  }
  0x11   :  { %19 = dma.hbm_to_vmem [thread:$0]  %s256_s0, 256, %s14_s7, [#allocation3], %s200_s16, %s200_s16, %s201_s17  }
  0x12   :  { %195 = dma.done.wait [#allocation3], 256  }
  0x13   :  { %196 = vsyncadd [#allocation3], 4294967040  ;;  %v228_v0 = vld [vmem:[#allocation2] sm:$0xff]  ;;  %vm33_vm0 = vcmask 1043456   ;;  %v230_v1 = vld [vmem:[#allocation2 + $0x8] sm:$0xff]  ;;  %s202_s0 = smov [#allocation5]  }
  0x14   :  { %v25_v2 = vmul.f32 %v228_v0, %v228_v0  ;;  %v26_v3 = vmul.f32 %v230_v1, %v230_v1  ;;  %s119_s20 = sshll.u32 %s202_s0, 4  ;;  %s120_s20 = int_to_ptr.vmem [resolvable:$true] %s119_s20 }
  0x15   :  { %s173_s21 = scalar_lea.vmem %s120_s20, 256  ;;  %p178_p9 = scmp.lt.s32.totalorder %s120_s20, %s120_s20 }
  0x16   :  { %v29_v4 = vcombine.high %v25_v2, %v25_v2  ;;  %v34_v5 = vsel %vm33_vm0, %v25_v2, 0.0  ;;  %v30_v6 = vcombine.high %v26_v3, %v26_v3  ;;  %v48_v7 = vsel %vm33_vm0, %v26_v3, 0.0  ;;  %p174_p8 = scmp.ne.s32.totalorder %s120_s20, %s173_s21  ;;  %p179_p10 = scmp.lt.s32.totalorder %s173_s21, %s173_s21 }
  0x17   :  { %v35_v8 = vrot.slane %v34_v5, 4  ;;  %v49_v9 = vrot.slane %v48_v7, 4 }
  0x18   :  { %v41_v10 = vsel %vm33_vm0, %v29_v4, 0.0  ;;  %v55_v11 = vsel %vm33_vm0, %v30_v6, 0.0  ;;  %p180_p11 = por %p179_p10, %p178_p9 }
  0x19   :  { %v36_v12 = vadd.f32 %v35_v8, %v34_v5  ;;  %v42_v13 = vrot.slane %v41_v10, 4  ;;  %v50_v14 = vadd.f32 %v49_v9, %v48_v7  ;;  %v56_v15 = vrot.slane %v55_v11, 4 }
  0x1a   :  { %p181_p12 = pnand %p180_p11, %p174_p8 }
  0x1b   :  { %v37_v16 = vrot.slane %v36_v12, 2  ;;  %v43_v17 = vadd.f32 %v42_v13, %v41_v10  ;;  %v51_v18 = vrot.slane %v50_v14, 2  ;;  %v57_v19 = vadd.f32 %v56_v15, %v55_v11 }
  0x1d   :  { %v38_v20 = vadd.f32 %v37_v16, %v36_v12  ;;  %v44_v21 = vrot.slane %v43_v17, 2  ;;  %v52_v22 = vadd.f32 %v51_v18, %v50_v14  ;;  %v58_v23 = vrot.slane %v57_v19, 2 }
  0x1f   :  { %v39_v24 = vrot.slane %v38_v20, 1  ;;  %v45_v25 = vadd.f32 %v44_v21, %v43_v17  ;;  %v53_v26 = vrot.slane %v52_v22, 1  ;;  %v59_v27 = vadd.f32 %v58_v23, %v57_v19 }
  0x21   :  { %v40_v28 = vadd.f32 %v39_v24, %v38_v20  ;;  %v46_v29 = vrot.slane %v45_v25, 1  ;;  %v54_v30 = vadd.f32 %v53_v26, %v52_v22  ;;  %v60_v31 = vrot.slane %v59_v27, 1 }
  0x23   :  { %v47_v32 = vadd.f32 %v46_v29, %v45_v25  ;;  %135 = vrsqrt.f32 %v40_v28  ;;  %v61_v33 = vadd.f32 %v60_v31, %v59_v27  ;;  %vm64_vm1 = vcmp.eq.f32.partialorder %v40_v28, inf }
  0x24   :  { %137 = vrsqrt.f32 %v54_v30  ;;  %vm66_vm2 = vcmp.eq.f32.partialorder %v40_v28, 0.0  ;;  %v67_v35 = vand.u32 2147483648, %v40_v28  ;;  %vm78_vm4 = vcmp.eq.f32.partialorder %v54_v30, inf }
  0x25   :  { %139 = vrsqrt.f32 %v47_v32  ;;  %vm71_vm3 = vcmp.eq.f32.partialorder %v47_v32, inf  ;;  %v81_v38 = vand.u32 2147483648, %v54_v30  ;;  %vm73_vm5 = vcmp.eq.f32.partialorder %v47_v32, 0.0 }
  0x26   :  { %141 = vrsqrt.f32 %v61_v33  ;;  %v74_v40 = vand.u32 2147483648, %v47_v32  ;;  %vm80_vm6 = vcmp.eq.f32.partialorder %v54_v30, 0.0  ;;  %vm85_vm7 = vcmp.eq.f32.partialorder %v61_v33, inf }
  0x27   :  { %v88_v45 = vand.u32 2147483648, %v61_v33  ;;  %vm87_vm8 = vcmp.eq.f32.partialorder %v61_v33, 0.0 }
  0x2d   :  { %v136_v34 = vpop.eup %135 }
  0x2e   :  { %v138_v36 = vpop.eup %137  ;;  %v63_v37 = vmul.f32 %v136_v34, %v40_v28 }
  0x2f   :  { %v140_v39 = vpop.eup %139  ;;  %v77_v41 = vmul.f32 %v138_v36, %v54_v30 }
  0x30   :  { %v142_v42 = vpop.eup %141  ;;  %v65_v43 = vsel %vm64_vm1, %v40_v28, %v63_v37  ;;  %v70_v44 = vmul.f32 %v140_v39, %v47_v32 }
  0x31   :  { %v68_v46 = vsel %vm66_vm2, %v67_v35, %v65_v43  ;;  %v79_v47 = vsel %vm78_vm4, %v54_v30, %v77_v41  ;;  %v84_v48 = vmul.f32 %v142_v42, %v61_v33 }
  0x32   :  { %v72_v49 = vsel %vm71_vm3, %v47_v32, %v70_v44  ;;  %v90_v50 = vmax.f32 %v68_v46, 1e-12  ;;  %v82_v51 = vsel %vm80_vm6, %v81_v38, %v79_v47 }
  0x33   :  { %v75_v52 = vsel %vm73_vm5, %v74_v40, %v72_v49  ;;  %v86_v53 = vsel %vm85_vm7, %v61_v33, %v84_v48  ;;  %v92_v54 = vmax.f32 %v82_v51, 1e-12 }
  0x34   :  { %v91_v55 = vmax.f32 %v75_v52, 1e-12  ;;  %143 = vrcp.f32 %v90_v50  ;;  %v89_v56 = vsel %vm87_vm8, %v88_v45, %v86_v53 }
  0x35   :  { %v93_v57 = vmax.f32 %v89_v56, 1e-12  ;;  %145 = vrcp.f32 %v92_v54 }
  0x36   :  { %147 = vrcp.f32 %v91_v55 }
  0x37   :  { %149 = vrcp.f32 %v93_v57 }
  0x3e   :  { %v144_v58 = vpop.eup %143 }
  0x3f   :  { %v146_v59 = vpop.eup %145 }
  0x40   :  { %v148_v60 = vpop.eup %147 }
  0x41   :  { %v150_v61 = vpop.eup %149  ;;  %v106_v62 = vcombine.low %v144_v58, %v148_v60 }
  0x42   :  { %v107_v63 = vcombine.low %v146_v59, %v150_v61 }
  0x43   :  { %v110_v2 = vmul.f32 %v106_v62, %v228_v0 }
  0x44   :  { %v111_v3 = vmul.f32 %v107_v63, %v230_v1 }
  0x45   :  { %112 = vst [vmem:[#allocation5] sm:$0xff] %v110_v2 }
  0x46   :  { %113 = vst [vmem:[#allocation5 + $0x8] sm:$0xff] %v111_v3 }
  0x47   :  { %184 = shalt.err (!%p181_p12)
}
  0x48   :  { %s185_s24 = scalar_lea.hbm %s257_s1, 256 }
  0x49   :  { %p186_p13 = scmp.ne.s32.totalorder %s257_s1, %s185_s24  ;;  %p189_p0 = scmp.lt.u32.totalorder %s185_s24, %s257_s1 }
  0x4b   :  { %p191_p1 = pnand %p189_p0, %p186_p13 }
  0x4d   :  { %194 = shalt.err (!%p191_p1)
}
  0x4e   :  { %125 = dma.vmem_to_hbm [thread:$0]  %s120_s20, 256, %s257_s1, [#allocation4], %s200_s16, %s200_s16, %s201_s17  }
  0x4f   :  { %197 = dma.done.wait [#allocation4], 256  }
  0x50   :  { %198 = vsyncadd [#allocation4], 4294967040 }
  0x51   :  { %129 = vsyncpa [#allocation3], 1 }
  0x52   :  { %130 = vsyncpa [#allocation4], 1 }

</bundles_post_ra>
